<compile_context>
chip_gen: v6e
topology: v6e:2x2x1
jax: 0.10.0
libtpu: 0.0.40
codegen_flags: <defaults>
</compile_context>

<pallas_src>
import jax
import jax.numpy as jnp
from jax.experimental import pallas as pl
from jax.experimental.pallas import tpu as pltpu

_LANE = 128
_SUBLANE = 8
_INV_SQRT2 = 0.7071067811865476


def _round_up(n, m):
    return ((n + m - 1) // m) * m


def _cdiv(a, b):
    return -(-a // b)


def _gelu_exact(h):
    # nn.GELU() default: 0.5 * h * (1 + erf(h / sqrt(2))) -- exact erf, f32.
    # TODO(synk): on v6e/v7x the elementwise math could run in bf16 (2 elems per
    # lane); kept in f32 for numerical parity and v5e (no bf16 VPU/EUP) support.
    return 0.5 * h * (1.0 + jax.lax.erf(h * jnp.float32(_INV_SQRT2)))


# ----------------------------------------------------------------------------
# Kernels
# ----------------------------------------------------------------------------
def _mlp_kernel_resident(x_ref, w1_ref, b1_ref, w2_ref, b2_ref, o_ref):
    # x_ref:  [TM, Dp] native dtype (cast to bf16 here; hides under the MXU)
    # w1_ref: [Dp, Hp] bf16 (resident)   b1_ref: [1, Hp] f32
    # w2_ref: [Hp, Dp] bf16 (resident)   b2_ref: [1, Dp] f32
    # o_ref:  [TM, Dp] activation dtype
    x = x_ref[...].astype(w1_ref.dtype)
    h = jnp.dot(x, w1_ref[...], preferred_element_type=jnp.float32) + b1_ref[...]
    h = _gelu_exact(h)
    # dropout(p=0.0) == identity (elided)
    o = jnp.dot(h.astype(w2_ref.dtype), w2_ref[...],
                preferred_element_type=jnp.float32) + b2_ref[...]
    # dropout(p=0.0) == identity (elided)
    o_ref[...] = o.astype(o_ref.dtype)


def _mlp_kernel_hsplit(x_ref, w1_ref, b1_ref, w2_ref, b2_ref, o_ref, acc_ref):
    # Grid: (M tiles [parallel], H tiles [arbitrary / reduction]).
    # GELU is elementwise over H, so streaming H tiles through fc1->GELU->fc2
    # and accumulating fc2 partials in f32 is exact.
    j = pl.program_id(1)

    @pl.when(j == 0)
    def _init():
        acc_ref[...] = jnp.zeros_like(acc_ref)

    x = x_ref[...].astype(w1_ref.dtype)
    h = jnp.dot(x, w1_ref[...], preferred_element_type=jnp.float32) + b1_ref[...]
    h = _gelu_exact(h)
    acc_ref[...] += jnp.dot(h.astype(w2_ref.dtype), w2_ref[...],
                            preferred_element_type=jnp.float32)

    @pl.when(j == pl.num_programs(1) - 1)
    def _finalize():
        o_ref[...] = (acc_ref[...] + b2_ref[...]).astype(o_ref.dtype)


# ----------------------------------------------------------------------------
# Sizing helpers
# ----------------------------------------------------------------------------
def _vmem_budget_bytes():
    try:
        cap = int(pltpu.get_tpu_info().vmem_capacity_bytes)
    except Exception:
        cap = 64 << 20  # conservative default (v7x per-TC VMEM)
    # Leave ~16 MiB headroom for Mosaic internal scratch; cap at 100 MiB on
    # 128 MiB parts (v5e/v6e); never go below the 32 MiB scoped-vmem default.
    return max(min(cap - (16 << 20), 100 << 20), 32 << 20)


def _choose_tm_resident(M, Dp, Hp, x_bytes, out_bytes, avail_bytes):
    # Per-row VMEM: double-buffered x and out tiles + f32 fc1/GELU intermediate.
    per_row = 2 * Dp * x_bytes + 2 * Dp * out_bytes + Hp * 4 + Dp * 4
    tm = avail_bytes // per_row if avail_bytes > 0 else _SUBLANE
    tm = int(min(tm, 1024, _round_up(M, _SUBLANE)))
    tm = max(tm, _SUBLANE)
    # v7x has 2 TensorCores sharing the "parallel" axis -> want >= 2 grid steps.
    if M > _SUBLANE and _cdiv(M, tm) < 2:
        tm = _round_up(_cdiv(M, 2), _SUBLANE)
    # MXU-friendly alignment (256x256 MXU on v6e/v7x) for large tiles.
    if tm >= 256:
        tm = (tm // 256) * 256
    else:
        tm = max((tm // _SUBLANE) * _SUBLANE, _SUBLANE)
    return tm


def _choose_split_tiles(M, Dp, Hp, x_bytes, out_bytes, w_bytes, budget,
                        max_hidden_tile=None):
    # Row tile: big enough to amortize re-streaming weights per M tile, but use
    # at most half the budget so the streamed H tiles get the rest.
    per_row = 2 * Dp * x_bytes + 2 * Dp * out_bytes + Dp * 4  # x/out tiles + f32 acc
    tm = min(512, (budget // 2) // per_row, _round_up(M, _SUBLANE))
    tm = max((int(tm) // _SUBLANE) * _SUBLANE, _SUBLANE)
    if M > _SUBLANE and _cdiv(M, tm) < 2:
        tm = _round_up(_cdiv(M, 2), _SUBLANE)
    fixed = tm * per_row + 2 * Dp * 4 + (2 << 20)             # + b2 + slack
    per_th = 4 * Dp * w_bytes + 8 + tm * 4                    # w1/w2 tiles (x2 buf) + b1 + f32 h
    bound = (budget - fixed) // per_th if budget > fixed else _LANE
    if max_hidden_tile is not None:
        bound = min(bound, max_hidden_tile)
    bound = max(int(bound), _LANE)
    # TH must be a multiple of 128 that divides Hp so no partial H tile leaks
    # out-of-bounds garbage into the fc2 accumulation.
    q = Hp // _LANE
    t = max(1, min(q, bound // _LANE))
    while q % t != 0:
        t -= 1
    return tm, t * _LANE


# ----------------------------------------------------------------------------
# pallas_call builders
# ----------------------------------------------------------------------------
def _resident_call(xm, w1p, b1p, w2p, b2p, out_dtype, tm, vmem_limit,
                   single_buffer_weights):
    M, Dp = xm.shape
    Hp = w1p.shape[1]
    x_bytes = xm.dtype.itemsize
    out_bytes = jnp.dtype(out_dtype).itemsize
    w_bytes = w1p.dtype.itemsize
    # Resident operands: constant index_map -> single-buffer them when supported.
    wkw = dict(pipeline_mode=pl.Buffered(1)) if single_buffer_weights else {}
    grid = (_cdiv(M, tm),)
    cost = pl.CostEstimate(
        flops=4 * M * Dp * Hp,
        transcendentals=M * Hp,
        bytes_accessed=(M * Dp * (x_bytes + out_bytes)
                        + (Dp * Hp + Hp * Dp) * w_bytes + (Hp + Dp) * 4))
    return pl.pallas_call(
        _mlp_kernel_resident,
        out_shape=jax.ShapeDtypeStruct((M, Dp), out_dtype),
        grid=grid,
        in_specs=[
            pl.BlockSpec((tm, Dp), lambda i: (i, 0)),             # x: row-tiled, pipelined
            pl.BlockSpec((Dp, Hp), lambda i: (0, 0), **wkw),      # w1: resident
            pl.BlockSpec((1, Hp), lambda i: (0, 0), **wkw),       # b1: resident
            pl.BlockSpec((Hp, Dp), lambda i: (0, 0), **wkw),      # w2: resident
            pl.BlockSpec((1, Dp), lambda i: (0, 0), **wkw),       # b2: resident
        ],
        out_specs=pl.BlockSpec((tm, Dp), lambda i: (i, 0)),
        compiler_params=pltpu.CompilerParams(
            dimension_semantics=("parallel",),
            vmem_limit_bytes=int(vmem_limit)),
        cost_estimate=cost,
    )(xm, w1p, b1p, w2p, b2p)


def _hsplit_call(xm, w1p, b1p, w2p, b2p, out_dtype, tm, th, vmem_limit):
    M, Dp = xm.shape
    Hp = w1p.shape[1]
    x_bytes = xm.dtype.itemsize
    out_bytes = jnp.dtype(out_dtype).itemsize
    w_bytes = w1p.dtype.itemsize
    n_i = _cdiv(M, tm)
    grid = (n_i, Hp // th)
    cost = pl.CostEstimate(
        flops=4 * M * Dp * Hp,
        transcendentals=M * Hp,
        bytes_accessed=(M * Dp * (x_bytes + out_bytes)
                        + n_i * ((Dp * Hp + Hp * Dp) * w_bytes + Hp * 4)
                        + Dp * 4))
    return pl.pallas_call(
        _mlp_kernel_hsplit,
        out_shape=jax.ShapeDtypeStruct((M, Dp), out_dtype),
        grid=grid,
        in_specs=[
            pl.BlockSpec((tm, Dp), lambda i, j: (i, 0)),   # x row tile (constant over j)
            pl.BlockSpec((Dp, th), lambda i, j: (0, j)),   # w1 column tile (streamed over H)
            pl.BlockSpec((1, th), lambda i, j: (0, j)),    # b1 tile
            pl.BlockSpec((th, Dp), lambda i, j: (j, 0)),   # w2 row tile (streamed over H)
            pl.BlockSpec((1, Dp), lambda i, j: (0, 0)),    # b2 (resident)
        ],
        out_specs=pl.BlockSpec((tm, Dp), lambda i, j: (i, 0)),
        scratch_shapes=[pltpu.VMEM((tm, Dp), jnp.float32)],
        compiler_params=pltpu.CompilerParams(
            dimension_semantics=("parallel", "arbitrary"),
            vmem_limit_bytes=int(vmem_limit)),
        cost_estimate=cost,
    )(xm, w1p, b1p, w2p, b2p)


# ----------------------------------------------------------------------------
# Public wrapper
# ----------------------------------------------------------------------------
def prepare_mlp_params(w1, b1, w2, b2, *, compute_dtype=jnp.bfloat16):
    """One-time weight prep (hoisted out of the per-call path): pad feature dims
    to the 128-lane width and cast weights to bf16; biases stay f32."""
    D, H = w1.shape
    assert w2.shape == (H, D) and b1.shape == (H,) and b2.shape == (D,)
    Dp, Hp = _round_up(D, _LANE), _round_up(H, _LANE)
    if (Dp, Hp) == (D, H):
        w1p = w1.astype(compute_dtype)
        w2p = w2.astype(compute_dtype)
        b1p = b1.astype(jnp.float32).reshape(1, H)
        b2p = b2.astype(jnp.float32).reshape(1, D)
    else:
        w1p = jnp.zeros((Dp, Hp), compute_dtype).at[:D, :H].set(w1.astype(compute_dtype))
        w2p = jnp.zeros((Hp, Dp), compute_dtype).at[:H, :D].set(w2.astype(compute_dtype))
        b1p = jnp.zeros((1, Hp), jnp.float32).at[0, :H].set(b1.astype(jnp.float32))
        b2p = jnp.zeros((1, Dp), jnp.float32).at[0, :D].set(b2.astype(jnp.float32))
    return {"w1": w1p, "b1": b1p, "w2": w2p, "b2": b2p, "d": D, "h": H}


def mlp_pallas(x, params, *, force_hsplit=False, max_hidden_tile=None):
    """x: [B, S, D]; params from prepare_mlp_params(). Returns [B, S, D] in x.dtype."""
    B, S, D = x.shape
    assert D == params["d"], "input feature dim mismatch"
    w1p, b1p, w2p, b2p = params["w1"], params["b1"], params["w2"], params["b2"]
    Dp, Hp = w1p.shape

    M = B * S
    xm = x.reshape(M, D)
    if Dp != D:
        # Rare path (D % 128 != 0): zero-pad the lane dim so MXU/stores run unmasked.
        xm = jnp.pad(xm, ((0, 0), (0, Dp - D)))

    out_dtype = x.dtype
    x_bytes = xm.dtype.itemsize
    out_bytes = jnp.dtype(out_dtype).itemsize
    w_bytes = w1p.dtype.itemsize

    budget = _vmem_budget_bytes()
    weight_slab = (Dp * Hp + Hp * Dp) * w_bytes + (Hp + Dp) * 4
    # Conservative fit check: assume default double-buffering of the weights.
    resident_fits = 2 * weight_slab <= budget - (8 << 20)

    if resident_fits and not force_hsplit:
        tm = _choose_tm_resident(M, Dp, Hp, x_bytes, out_bytes,
                                 budget - 2 * weight_slab - (2 << 20))
        out = None
        # Prefer single-buffered resident weights (halves their VMEM footprint);
        # fall back to default buffering if pipeline_mode=pl.Buffered(1) is not
        # supported by the installed Pallas.
        for single_buf in (True, False):
            try:
                out = _resident_call(xm, w1p, b1p, w2p, b2p, out_dtype, tm,
                                     budget, single_buf)
                break
            except Exception:
                if not single_buf:
                    raise
        assert out is not None
    else:
        # Weights too large for resident VMEM (e.g. big H on v7x): stream H tiles.
        tm, th = _choose_split_tiles(M, Dp, Hp, x_bytes, out_bytes, w_bytes,
                                     budget, max_hidden_tile)
        out = _hsplit_call(xm, w1p, b1p, w2p, b2p, out_dtype, tm, th, budget)

    if Dp != D:
        out = out[:, :D]
    return out.reshape(B, S, D)


# TODO(synk): nn.Dropout with p > 0 in training mode is not implemented (the
# module default p=0.0 is the identity); would use pltpu.prng_seed /
# pltpu.prng_random_bits to build the keep mask in-kernel if needed.


# ----------------------------------------------------------------------------
# References & self-test
# ----------------------------------------------------------------------------
def mlp_reference_mixed(x, w1, b1, w2, b2, compute_dtype=jnp.bfloat16):
    """Pure-JAX reference mirroring the kernel's bf16-matmul / f32 numerics."""
    cd = compute_dtype
    h = jnp.einsum("bsd,dh->bsh", x.astype(cd), w1.astype(cd),
                   preferred_element_type=jnp.float32) + b1.astype(jnp.float32)
    h = 0.5 * h * (1.0 + jax.lax.erf(h * jnp.float32(_INV_SQRT2)))
    o = jnp.einsum("bsh,hd->bsd", h.astype(cd), w2.astype(cd),
                   preferred_element_type=jnp.float32) + b2.astype(jnp.float32)
    return o.astype(x.dtype)


def mlp_reference_f32(x, w1, b1, w2, b2):
    h = jnp.einsum("bsd,dh->bsh", x, w1) + b1
    h = 0.5 * h * (1.0 + jax.lax.erf(h / jnp.sqrt(2.0)))
    return jnp.einsum("bsh,hd->bsd", h, w2) + b2


if __name__ == "__main__":
    key = jax.random.PRNGKey(0)
    B, S = 2, 8
    input_dim, hidden_dim = 32, 64

    k_x, k_w1, k_b1, k_w2, k_b2 = jax.random.split(key, 5)
    x = jax.random.normal(k_x, (B, S, input_dim), dtype=jnp.float32)
    # PyTorch Linear weights are [out, in]; stored transposed as [in, out] here.
    w1 = jax.random.normal(k_w1, (input_dim, hidden_dim), dtype=jnp.float32) * 0.05
    b1 = jax.random.normal(k_b1, (hidden_dim,), dtype=jnp.float32) * 0.05
    w2 = jax.random.normal(k_w2, (hidden_dim, input_dim), dtype=jnp.float32) * 0.05
    b2 = jax.random.normal(k_b2, (input_dim,), dtype=jnp.float32) * 0.05

    # One-time weight preparation (hoisted pad/cast).
    params = prepare_mlp_params(w1, b1, w2, b2)

    # Resident-weight path.
    out = jax.block_until_ready(mlp_pallas(x, params))
    ref_mixed = jax.block_until_ready(mlp_reference_mixed(x, w1, b1, w2, b2))
    ref_f32 = jax.block_until_ready(mlp_reference_f32(x, w1, b1, w2, b2))
    assert out.shape == (B, S, input_dim) and out.dtype == x.dtype
    assert jnp.allclose(out, ref_mixed, atol=1e-4, rtol=1e-4), \
        "resident: mismatch vs mixed-precision reference"
    assert jnp.allclose(out, ref_f32, atol=2e-2, rtol=2e-2), \
        "resident: mismatch vs f32 reference"

    # Streamed-H (large-hidden / v7x) path: force it on a small shape with a
    # capped H tile so the reduction axis + accumulator finalize are exercised.
    hidden_big = 256
    k_w1b, k_b1b, k_w2b, k_b2b = jax.random.split(jax.random.PRNGKey(1), 4)
    w1b = jax.random.normal(k_w1b, (input_dim, hidden_big), dtype=jnp.float32) * 0.05
    b1b = jax.random.normal(k_b1b, (hidden_big,), dtype=jnp.float32) * 0.05
    w2b = jax.random.normal(k_w2b, (hidden_big, input_dim), dtype=jnp.float32) * 0.05
    b2b = jax.random.normal(k_b2b, (input_dim,), dtype=jnp.float32) * 0.05
    params_b = prepare_mlp_params(w1b, b1b, w2b, b2b)
    out_b = jax.block_until_ready(
        mlp_pallas(x, params_b, force_hsplit=True, max_hidden_tile=128))
    ref_b = jax.block_until_ready(mlp_reference_mixed(x, w1b, b1b, w2b, b2b))
    assert jnp.allclose(out_b, ref_b, atol=1e-4, rtol=1e-4), \
        "hsplit: mismatch vs mixed-precision reference"

    print("KERNEL_OK")
</pallas_src>

<mosaic_0001>
module attributes {stable_mosaic.version = 11 : i64} {
  func.func @_mlp_kernel_resident(%arg0: i32, %arg1: memref<8x128xf32, #tpu.memory_space<vmem>>, %arg2: memref<128x128xbf16, #tpu.memory_space<vmem>>, %arg3: memref<1x128xf32, #tpu.memory_space<vmem>>, %arg4: memref<128x128xbf16, #tpu.memory_space<vmem>>, %arg5: memref<1x128xf32, #tpu.memory_space<vmem>>, %arg6: memref<8x128xf32, #tpu.memory_space<vmem>>) attributes {dimension_semantics = [#tpu.dimension_semantics<parallel>], iteration_bounds = array<i64: 2>, scalar_prefetch = 0 : i64, scratch_operands = 0 : i64, tpu.core_type = #tpu.core_type<tc>, window_params = [{transform_indices = @transform_0, window_bounds = array<i64: 8, 128>}, {pipeline_mode = #tpu.pipeline_mode<synchronous>, transform_indices = @transform_1, window_bounds = array<i64: 128, 128>}, {pipeline_mode = #tpu.pipeline_mode<synchronous>, transform_indices = @transform_2, window_bounds = array<i64: 1, 128>}, {pipeline_mode = #tpu.pipeline_mode<synchronous>, transform_indices = @transform_3, window_bounds = array<i64: 128, 128>}, {pipeline_mode = #tpu.pipeline_mode<synchronous>, transform_indices = @transform_4, window_bounds = array<i64: 1, 128>}, {transform_indices = @transform_5, window_bounds = array<i64: 8, 128>}]} {
    %c0 = arith.constant 0 : index
    %c0_0 = arith.constant 0 : index
    %0 = vector.load %arg1[%c0, %c0_0] : memref<8x128xf32, #tpu.memory_space<vmem>>, vector<8x128xf32>
    %1 = arith.truncf %0 : vector<8x128xf32> to vector<8x128xbf16>
    %c0_1 = arith.constant 0 : index
    %c0_2 = arith.constant 0 : index
    %2 = vector.load %arg2[%c0_1, %c0_2] : memref<128x128xbf16, #tpu.memory_space<vmem>>, vector<128x128xbf16>
    %cst = arith.constant dense<0.000000e+00> : vector<8x128xf32>
    %3 = tpu.matmul %1, %2, %cst {dimension_numbers = #tpu.dot_dimension_numbers<[1], [0], [0], [1], [0, 0, 1, 1], [], []>} : vector<8x128xbf16>, vector<128x128xbf16>, vector<8x128xf32> -> vector<8x128xf32>
    %c0_3 = arith.constant 0 : index
    %c0_4 = arith.constant 0 : index
    %4 = vector.load %arg3[%c0_3, %c0_4] : memref<1x128xf32, #tpu.memory_space<vmem>>, vector<1x128xf32>
    %5 = vector.broadcast %4 : vector<1x128xf32> to vector<8x128xf32>
    %6 = arith.addf %3, %5 : vector<8x128xf32>
    %cst_5 = arith.constant 5.000000e-01 : f32
    %7 = vector.broadcast %cst_5 : f32 to vector<8x128xf32>
    %8 = arith.mulf %7, %6 : vector<8x128xf32>
    %cst_6 = arith.constant 0.707106769 : f32
    %9 = vector.broadcast %cst_6 : f32 to vector<8x128xf32>
    %10 = arith.mulf %6, %9 : vector<8x128xf32>
    %11 = math.erf %10 : vector<8x128xf32>
    %cst_7 = arith.constant 1.000000e+00 : f32
    %12 = vector.broadcast %cst_7 : f32 to vector<8x128xf32>
    %13 = arith.addf %12, %11 : vector<8x128xf32>
    %14 = arith.mulf %8, %13 : vector<8x128xf32>
    %15 = arith.truncf %14 : vector<8x128xf32> to vector<8x128xbf16>
    %c0_8 = arith.constant 0 : index
    %c0_9 = arith.constant 0 : index
    %16 = vector.load %arg4[%c0_8, %c0_9] : memref<128x128xbf16, #tpu.memory_space<vmem>>, vector<128x128xbf16>
    %cst_10 = arith.constant dense<0.000000e+00> : vector<8x128xf32>
    %17 = tpu.matmul %15, %16, %cst_10 {dimension_numbers = #tpu.dot_dimension_numbers<[1], [0], [0], [1], [0, 0, 1, 1], [], []>} : vector<8x128xbf16>, vector<128x128xbf16>, vector<8x128xf32> -> vector<8x128xf32>
    %c0_11 = arith.constant 0 : index
    %c0_12 = arith.constant 0 : index
    %18 = vector.load %arg5[%c0_11, %c0_12] : memref<1x128xf32, #tpu.memory_space<vmem>>, vector<1x128xf32>
    %19 = vector.broadcast %18 : vector<1x128xf32> to vector<8x128xf32>
    %20 = arith.addf %17, %19 : vector<8x128xf32>
    %c0_13 = arith.constant 0 : index
    %c0_14 = arith.constant 0 : index
    %21 = vector.load %arg6[%c0_13, %c0_14] : memref<8x128xf32, #tpu.memory_space<vmem>>, vector<8x128xf32>
    tpu.vector_store %arg6[%c0_13, %c0_14], %20 {strides = array<i32>} : memref<8x128xf32, #tpu.memory_space<vmem>>, vector<8x128xf32>,
    return
  }
  func.func @transform_0(%arg0: i32) -> (i32, i32) {
    %c0_i32 = arith.constant 0 : i32
    %c0_i32_0 = arith.constant 0 : i32
    return %arg0, %c0_i32 : i32, i32
  }
  func.func @transform_1(%arg0: i32) -> (i32, i32) {
    %c0_i32 = arith.constant 0 : i32
    %c0_i32_0 = arith.constant 0 : i32
    %c0_i32_1 = arith.constant 0 : i32
    return %c0_i32, %c0_i32_0 : i32, i32
  }
  func.func @transform_2(%arg0: i32) -> (i32, i32) {
    %c0_i32 = arith.constant 0 : i32
    %c0_i32_0 = arith.constant 0 : i32
    %c0_i32_1 = arith.constant 0 : i32
    return %c0_i32, %c0_i32_0 : i32, i32
  }
  func.func @transform_3(%arg0: i32) -> (i32, i32) {
    %c0_i32 = arith.constant 0 : i32
    %c0_i32_0 = arith.constant 0 : i32
    %c0_i32_1 = arith.constant 0 : i32
    return %c0_i32, %c0_i32_0 : i32, i32
  }
  func.func @transform_4(%arg0: i32) -> (i32, i32) {
    %c0_i32 = arith.constant 0 : i32
    %c0_i32_0 = arith.constant 0 : i32
    %c0_i32_1 = arith.constant 0 : i32
    return %c0_i32, %c0_i32_0 : i32, i32
  }
  func.func @transform_5(%arg0: i32) -> (i32, i32) {
    %c0_i32 = arith.constant 0 : i32
    %c0_i32_0 = arith.constant 0 : i32
    return %arg0, %c0_i32 : i32, i32
  }
}

module attributes {stable_mosaic.version = 11 : i64} {
  func.func @_mlp_kernel_resident(%arg0: i32, %arg1: memref<8x128xf32, #tpu.memory_space<vmem>>, %arg2: memref<128x128xbf16, #tpu.memory_space<vmem>>, %arg3: memref<1x128xf32, #tpu.memory_space<vmem>>, %arg4: memref<128x128xbf16, #tpu.memory_space<vmem>>, %arg5: memref<1x128xf32, #tpu.memory_space<vmem>>, %arg6: memref<8x128xf32, #tpu.memory_space<vmem>>) attributes {dimension_semantics = [#tpu.dimension_semantics<parallel>], iteration_bounds = array<i64: 2>, scalar_prefetch = 0 : i64, scratch_operands = 0 : i64, tpu.core_type = #tpu.core_type<tc>, window_params = [{transform_indices = @transform_0, window_bounds = array<i64: 8, 128>}, {pipeline_mode = #tpu.pipeline_mode<synchronous>, transform_indices = @transform_1, window_bounds = array<i64: 128, 128>}, {pipeline_mode = #tpu.pipeline_mode<synchronous>, transform_indices = @transform_2, window_bounds = array<i64: 1, 128>}, {pipeline_mode = #tpu.pipeline_mode<synchronous>, transform_indices = @transform_3, window_bounds = array<i64: 128, 128>}, {pipeline_mode = #tpu.pipeline_mode<synchronous>, transform_indices = @transform_4, window_bounds = array<i64: 1, 128>}, {transform_indices = @transform_5, window_bounds = array<i64: 8, 128>}]} {
    %c0 = arith.constant 0 : index
    %c0_0 = arith.constant 0 : index
    %0 = vector.load %arg1[%c0, %c0_0] : memref<8x128xf32, #tpu.memory_space<vmem>>, vector<8x128xf32>
    %1 = arith.truncf %0 : vector<8x128xf32> to vector<8x128xbf16>
    %c0_1 = arith.constant 0 : index
    %c0_2 = arith.constant 0 : index
    %2 = vector.load %arg2[%c0_1, %c0_2] : memref<128x128xbf16, #tpu.memory_space<vmem>>, vector<128x128xbf16>
    %cst = arith.constant dense<0.000000e+00> : vector<8x128xf32>
    %3 = tpu.matmul %1, %2, %cst {dimension_numbers = #tpu.dot_dimension_numbers<[1], [0], [0], [1], [0, 0, 1, 1], [], []>} : vector<8x128xbf16>, vector<128x128xbf16>, vector<8x128xf32> -> vector<8x128xf32>
    %c0_3 = arith.constant 0 : index
    %c0_4 = arith.constant 0 : index
    %4 = vector.load %arg3[%c0_3, %c0_4] : memref<1x128xf32, #tpu.memory_space<vmem>>, vector<1x128xf32>
    %5 = vector.broadcast %4 : vector<1x128xf32> to vector<8x128xf32>
    %6 = arith.addf %3, %5 : vector<8x128xf32>
    %cst_5 = arith.constant 5.000000e-01 : f32
    %7 = vector.broadcast %cst_5 : f32 to vector<8x128xf32>
    %8 = arith.mulf %7, %6 : vector<8x128xf32>
    %cst_6 = arith.constant 0.707106769 : f32
    %9 = vector.broadcast %cst_6 : f32 to vector<8x128xf32>
    %10 = arith.mulf %6, %9 : vector<8x128xf32>
    %11 = math.erf %10 : vector<8x128xf32>
    %cst_7 = arith.constant 1.000000e+00 : f32
    %12 = vector.broadcast %cst_7 : f32 to vector<8x128xf32>
    %13 = arith.addf %12, %11 : vector<8x128xf32>
    %14 = arith.mulf %8, %13 : vector<8x128xf32>
    %15 = arith.truncf %14 : vector<8x128xf32> to vector<8x128xbf16>
    %c0_8 = arith.constant 0 : index
    %c0_9 = arith.constant 0 : index
    %16 = vector.load %arg4[%c0_8, %c0_9] : memref<128x128xbf16, #tpu.memory_space<vmem>>, vector<128x128xbf16>
    %cst_10 = arith.constant dense<0.000000e+00> : vector<8x128xf32>
    %17 = tpu.matmul %15, %16, %cst_10 {dimension_numbers = #tpu.dot_dimension_numbers<[1], [0], [0], [1], [0, 0, 1, 1], [], []>} : vector<8x128xbf16>, vector<128x128xbf16>, vector<8x128xf32> -> vector<8x128xf32>
    %c0_11 = arith.constant 0 : index
    %c0_12 = arith.constant 0 : index
    %18 = vector.load %arg5[%c0_11, %c0_12] : memref<1x128xf32, #tpu.memory_space<vmem>>, vector<1x128xf32>
    %19 = vector.broadcast %18 : vector<1x128xf32> to vector<8x128xf32>
    %20 = arith.addf %17, %19 : vector<8x128xf32>
    %c0_13 = arith.constant 0 : index
    %c0_14 = arith.constant 0 : index
    %21 = vector.load %arg6[%c0_13, %c0_14] : memref<8x128xf32, #tpu.memory_space<vmem>>, vector<8x128xf32>
    tpu.vector_store %arg6[%c0_13, %c0_14], %20 {strides = array<i32>} : memref<8x128xf32, #tpu.memory_space<vmem>>, vector<8x128xf32>,
    return
  }
  func.func @transform_0(%arg0: i32) -> (i32, i32) {
    %c0_i32 = arith.constant 0 : i32
    %c0_i32_0 = arith.constant 0 : i32
    return %arg0, %c0_i32 : i32, i32
  }
  func.func @transform_1(%arg0: i32) -> (i32, i32) {
    %c0_i32 = arith.constant 0 : i32
    %c0_i32_0 = arith.constant 0 : i32
    %c0_i32_1 = arith.constant 0 : i32
    return %c0_i32, %c0_i32_0 : i32, i32
  }
  func.func @transform_2(%arg0: i32) -> (i32, i32) {
    %c0_i32 = arith.constant 0 : i32
    %c0_i32_0 = arith.constant 0 : i32
    %c0_i32_1 = arith.constant 0 : i32
    return %c0_i32, %c0_i32_0 : i32, i32
  }
  func.func @transform_3(%arg0: i32) -> (i32, i32) {
    %c0_i32 = arith.constant 0 : i32
    %c0_i32_0 = arith.constant 0 : i32
    %c0_i32_1 = arith.constant 0 : i32
    return %c0_i32, %c0_i32_0 : i32, i32
  }
  func.func @transform_4(%arg0: i32) -> (i32, i32) {
    %c0_i32 = arith.constant 0 : i32
    %c0_i32_0 = arith.constant 0 : i32
    %c0_i32_1 = arith.constant 0 : i32
    return %c0_i32, %c0_i32_0 : i32, i32
  }
  func.func @transform_5(%arg0: i32) -> (i32, i32) {
    %c0_i32 = arith.constant 0 : i32
    %c0_i32_0 = arith.constant 0 : i32
    return %arg0, %c0_i32 : i32, i32
  }
}

</mosaic_0001>

<bundles_post_ra>
// kernel: tpu_custom_call.1
= control target key start
LH: loop header
LB: loop body
LE: loop exit
PB: predicated region body
PF: predicated region fallthrough
CT: control target
= control target key end

     0   :  { %10 = vsyncpa [#allocation3], 0  ;;  %s1163_s0 = inlined_call_operand.hbm [shape: f32[16,128], index: 0, kind: input, shape index: {}]   ;;  %s1164_s1 = inlined_call_operand.hbm [shape: bf16[128,128], index: 1, kind: input, shape index: {}]   ;;  %s1165_s2 = inlined_call_operand.vmem [shape: f32[1,128], index: 2, kind: input, shape index: {}]   ;;  %s1166_s3 = inlined_call_operand.hbm [shape: bf16[128,128], index: 3, kind: input, shape index: {}]   ;;  %s1167_s4 = inlined_call_operand.vmem [shape: f32[1,128], index: 4, kind: input, shape index: {}]   ;;  %s1168_s5 = inlined_call_operand.hbm [shape: f32[16,128], index: 5, kind: output, shape index: {}]  }
   0x1   :  { %12 = vsyncpa [#allocation3 + $0x1], 0 }
   0x2   :  { %13 = vsyncpa [#allocation6], 0 }
   0x3   :  { %14 = vsyncpa [#allocation4], 0 }
   0x4   :  { %16 = vsyncpa [#allocation4 + $0x1], 0  ;;  %s973_s18 = smov 0   ;;  %s975_s19 = smov 0  }
   0x5   :  { %s977_s20 = smov 0   ;;  %s979_s21 = smov 0  }
   0x6 LB: > { %s994_s22 = sadd.s32 4294967295, %s933_s21   ;;  %s604_s23 = sadd.s32 4294967294, %s933_s21   ;;  %s933_s21 = sphi %s979_s21, %s1190_s21   ;;  %s929_s20 = sphi %s977_s20, %s1189_s20   ;;  %s925_s19 = sphi %s975_s19, %s1188_s19   ;;  %s921_s18 = sphi %s973_s18, %s1187_s18  }
   0x7   : > { %p42_p0 = scmp.ne.s32.totalorder %s925_s19, %s921_s18  ;;  %p1169_p1 = scmp.eq.s32.totalorder %s994_s22, 0 }
   0x8   : > { %p156_p3 = scmp.eq.s32.totalorder %s604_s23, 1  ;;  %p605_p5 = scmp.ge.s32.totalorder %s933_s21, 1 }
   0x9   : > { %p1003_p4 = por %p1169_p1, %p42_p0  ;;  %p163_p7 = scmp.lt.s32.totalorder %s933_s21, 3 }
   0xa   : > { %p1008_p6 = por %p156_p3, %p42_p0  ;;  %s935_s27 = smov [#allocation5]  }
   0xb   : > { %s1173_s24 = scalar_select %p1003_p4, 1, 0 }
   0xc   : > { %s1174_s25 = scalar_select %p1008_p6, 1, 0 }
   0xd   : > { %p1013_p8 = pnand %p605_p5, %p163_p7  ;;  %s175_s28 = sshll.u32 %s935_s27, 4  ;;  %s176_s28 = int_to_ptr.vmem [resolvable:$true] %s175_s28 }
   0xe   : > { %s936_s30 = smov [#allocation7]   ;;  %s796_s7 = scalar_lea.vmem %s176_s28, 1024 }
   0xf   : > { %s1175_s26 = scalar_select %p1013_p8, 1, 0 }
  0x10   : > { %p708_p9 = pneg %p1013_p8  ;;  %s191_s6 = sshll.u32 %s936_s30, 4  ;;  %s192_s6 = int_to_ptr.vmem [resolvable:$true] %s191_s6 }
  0x11   : > { %p797_p13 = scmp.ne.s32.totalorder %s176_s28, %s796_s7  ;;  %p804_p5 = scmp.lt.s32.totalorder %s176_s28, %s176_s28 }
  0x12   : > { %p1022_p11 = pnand %p708_p9, %p1169_p1  ;;  %p805_p7 = scmp.lt.s32.totalorder %s796_s7, %s796_s7 }
  0x14   : > { %p787_p12 = pneg %p1022_p11  ;;  %p806_p10 = por %p805_p7, %p804_p5 }
  0x16   : > { %p799_p0 = pnand %p797_p13, %p787_p12 }
  0x18   : > { %p800_p3 = pneg %p799_p0 }
  0x1a   : > { %p807_p9 = pnand %p806_p10, %p800_p3 }
  0x1c   : > { %810 = shalt.err (!%p807_p9)
}
  0x1d   : > { %s937_s8 = smov 64   ;;  %s938_s9 = smov 4  }
  0x1e   : > { %711 = dma.hbm_to_vmem [thread:$0]  (!%p1022_p11), %s1164_s1, 1024, %s176_s28, [#allocation6], %s937_s8, %s937_s8, %s938_s9  }
  0x1f   : > { %s822_s12 = scalar_lea.vmem %s192_s6, 1024  ;;  %p830_p2 = scmp.lt.s32.totalorder %s192_s6, %s192_s6 }
  0x20   : > { %p823_p1 = scmp.ne.s32.totalorder %s192_s6, %s822_s12  ;;  %p831_p6 = scmp.lt.s32.totalorder %s822_s12, %s822_s12 }
  0x22   : > { %p825_p13 = pnand %p823_p1, %p787_p12  ;;  %p832_p5 = por %p831_p6, %p830_p2 }
  0x24   : > { %p826_p0 = pneg %p825_p13 }
  0x26   : > { %p833_p10 = pnand %p832_p5, %p826_p0 }
  0x28   : > { %836 = shalt.err (!%p833_p10)
}
  0x29   : > { %714 = dma.hbm_to_vmem [thread:$0]  (!%p1022_p11), %s1166_s3, 1024, %s192_s6, [#allocation6], %s937_s8, %s937_s8, %s938_s9  }
  0x2a   : > { %s1045_s15 = sadd.s32 1, %s933_s21   ;;  %s29_s16 = sadd.s32 1, %s929_s20 }
  0x2b   : > { %s26_s17 = ssub.s32 %s933_s21, %s1045_s15  ;;  %p36_p1 = scmp.ne.s32.totalorder %s929_s20, %s925_s19 }
  0x2c   : > { %p27_p2 = scmp.eq.s32.totalorder %s26_s17, 0  ;;  %p37_p6 = scmp.eq.s32.totalorder %s933_s21, 0 }
  0x2d   : > { %p1177_p12 = scmp.eq.s32.totalorder %s994_s22, 1  ;;  %p725_p7 = scmp.lt.s32.totalorder %s933_s21, 2 }
  0x2e   : > { %s1061_s27 = scalar_select %p27_p2, %s929_s20, %s29_s16  }
  0x2f   : > { %p1055_p3 = por %p1177_p12, %p36_p1  ;;  %p38_p9 = por %p37_p6, %p36_p1 }
  0x30   : > { %s208_s28 = sand.u32 1, %s929_s20   ;;  %s610_s30 = sshll.u32 %s933_s21, 7 }
  0x31   : > { %s1178_s23 = scalar_select %p1055_p3, 1, 0 }
  0x32   : > { %s609_s29 = sshll.u32 %s208_s28, 3  ;;  %s1068_s8 = scalar_lea.hbm %s1163_s0, %s610_s30 }
  0x33   : > { %s212_s9 = scalar_lea.vmem [#allocation2], %s609_s29  ;;  %p1070_p11 = pnand %p725_p7, %p38_p9 }
  0x34   : > { %s219_s10 = sshll.u32 %s212_s9, 4  ;;  %s209_s12 = scalar_lea.sflag [#allocation3], %s208_s28  ;;  %s220_s10 = int_to_ptr.vmem [resolvable:$true] %s219_s10 }
  0x35   : > { %s837_s13 = scalar_lea.hbm %s1068_s8, 128  ;;  %p839_p0 = pneg %p1070_p11 }
  0x36   : > { %p838_p13 = scmp.ne.s32.totalorder %s1068_s8, %s837_s13  ;;  %s842_s17 = scalar_lea.hbm %s1163_s0, 256 }
  0x37   : > { %p843_p1 = scmp.lt.s32.totalorder %s1068_s8, %s1163_s0  ;;  %p844_p2 = scmp.lt.s32.totalorder %s842_s17, %s837_s13 }
  0x38   : > { %p840_p5 = pnand %p839_p0, %p838_p13 }
  0x39   : > { %p845_p6 = por %p844_p2, %p843_p1 }
  0x3a   : > { %p841_p10 = pneg %p840_p5 }
  0x3c   : > { %p846_p12 = pnand %p845_p6, %p841_p10 }
  0x3e   : > { %849 = shalt.err (!%p846_p12)
}
  0x3f   : > { %s850_s6 = scalar_lea.vmem %s220_s10, 128  ;;  %s939_s28 = smov [#allocation2]  }
  0x40   : > { %p851_p7 = scmp.ne.s32.totalorder %s220_s10, %s850_s6  ;;  %s855_s7 = sshll.u32 %s939_s28, 4  ;;  %s856_s7 = int_to_ptr.vmem [resolvable:$false] %s855_s7 }
  0x41   : > { %s857_s9 = scalar_lea.vmem %s856_s7, 256  ;;  %p858_p13 = scmp.lt.s32.totalorder %s220_s10, %s856_s7 }
  0x42   : > { %p853_p9 = pnand %p851_p7, %p839_p0  ;;  %p859_p5 = scmp.lt.s32.totalorder %s857_s9, %s850_s6 }
  0x44   : > { %p854_p3 = pneg %p853_p9  ;;  %p860_p4 = por %p859_p5, %p858_p13 }
  0x46   : > { %p861_p8 = pnand %p860_p4, %p854_p3 }
  0x48   : > { %864 = shalt.err (!%p861_p8)
}
  0x49   : > { %718 = dma.hbm_to_vmem [thread:$0]  (!%p1070_p11), %s1068_s8, 128, %s220_s10, %s209_s12  }
  0x4a   : > { %p1180_p10 = scmp.ne.s32.totalorder %s1175_s26, 0 }
  0x4b   : > { %s1091_s13 = sand.u32 (!%p1180_p10), 1, %s925_s19   ;;  %p1181_p4 = scmp.ne.s32.totalorder (!%p1180_p10), %s1173_s24, 0 }
  0x4c   : > { %228 = sbr.rel (%p1180_p10) target bundleno = 545 (0x221), region = 40  ;;  %s612_s14 = sshll.u32 (!%p1180_p10), %s1091_s13, 3 }
  0x4d   : > { %s231_s16 = scalar_lea.sflag (!%p1180_p10), [#allocation3], %s1091_s13  ;;  %s1097_s17 = scalar_lea.vmem (!%p1180_p10), [#allocation2], %s612_s14 }
  0x51   : > { %908 = dma.done.wait (%p1181_p4), %s231_s16, 128  }
  0x52   : > { %910 = vsyncadd (%p1181_p4), %s231_s16, 4294967168  ;;  %p1182_p8 = scmp.eq.s32.totalorder %s994_s22, 0 }
  0x54   : > { %912 = dma.done.wait (%p1182_p8), [#allocation6], 2048   ;;  %p1183_p3 = pmov %p1182_p8 }
  0x55   : > { %v940_v0 = vmov 0.0   ;;  %vm941_vm0 = vmmov 0   ;;  %v767_v1 = vld [vmem:[#allocation5 + $0x38] sm:$0xff]   ;;  %v768_v2 = vld [vmem:[#allocation5 + $0x30] sm:$0xff]   ;;  %v769_v3 = vld [vmem:[#allocation5 + $0x28] sm:$0xff]   ;;  %s635_s11 = sshll.u32 %s994_s22, 7 }
  0x56   : > { %914 = vsyncadd (%p1183_p3), [#allocation6], 4294965248  ;;  %656 = vmatprep.subr.bf16.mxu0 %v940_v0  ;;  %672 = vmatprep.mubr.msk.bf16.mxu0 %vm941_vm0, %v940_v0  ;;  %v775_v4 = vld [vmem:[#allocation7 + $0x38] sm:$0xff]   ;;  %v770_v5 = vld [vmem:[#allocation5 + $0x20] sm:$0xff]   ;;  %s268_s12 = scalar_lea.vmem [#allocation8], %s612_s14  ;;  %s1120_s28 = scalar_lea.hbm %s1168_s5, %s635_s11 }
  0x57   : > { %676 = vmatprep.subr.bf16.mxu1 %v940_v0  ;;  %692 = vmatprep.mubr.msk.bf16.mxu1 %vm941_vm0, %v940_v0  ;;  %v776_v6 = vld [vmem:[#allocation7 + $0x30] sm:$0xff]   ;;  %v771_v7 = vld [vmem:[#allocation5 + $0x18] sm:$0xff]   ;;  %v773_v9 = vld [vmem:[#allocation5 + $0x8] sm:$0xff]   ;;  %s515_s30 = sshll.u32 %s268_s12, 4  ;;  %s502_s7 = scalar_lea.sflag [#allocation4], %s1091_s13  ;;  %s1122_s30 = int_to_ptr.vmem [resolvable:$true] %s515_s30 }
  0x58   : > { %657 = vmatpush3.bf16.msra.mxu0 %v767_v1  ;;  %677 = vmatpush3.bf16.msra.mxu1 %v775_v4  ;;  %v772_v8 = vld [vmem:[#allocation5 + $0x10] sm:$0xff]   ;;  %v774_v10 = vld [vmem:[#allocation5] sm:$0xff]   ;;  %v777_v13 = vld [vmem:[#allocation7 + $0x28] sm:$0xff]   ;;  %s865_s22 = scalar_lea.vmem %s1122_s30, 128  ;;  %p1184_p0 = scmp.ne.s32.totalorder %s1178_s23, 0 }
  0x59   : > { %658 = vmatprep.subr.bf16.mxu0 %v940_v0  ;;  %678 = vmatprep.subr.bf16.mxu1 %v940_v0  ;;  %v270_v11 = vld [vmem:[%s1097_s17] sm:$0xff]  ;;  %v778_v14 = vld [vmem:[#allocation7 + $0x20] sm:$0xff]   ;;  %v781_v17 = vld [vmem:[#allocation7 + $0x8] sm:$0xff]   ;;  %p866_p11 = scmp.ne.s32.totalorder %s1122_s30, %s865_s22  ;;  %s942_s9 = smov [#allocation8]  }
  0x5a   : > { %v271_v12 = vpack.c.bf16 %v270_v11, %v270_v11  ;;  %v779_v15 = vld [vmem:[#allocation7 + $0x18] sm:$0xff]   ;;  %v780_v16 = vld [vmem:[#allocation7 + $0x10] sm:$0xff]   ;;  %v782_v18 = vld [vmem:[#allocation7] sm:$0xff]   ;;  %s869_s14 = sshll.u32 %s942_s9, 4  ;;  %s870_s14 = int_to_ptr.vmem [resolvable:$false] %s869_s14 }
  0x5b   : > { %v616_v19 = vld [vmem:[%s1165_s2] ss:$0 sm:$0xff]  ;;  %p867_p1 = pnand %p866_p11, %p1184_p0  ;;  %s871_s16 = scalar_lea.vmem %s870_s14, 256 }
  0x5c   : > { %659 = vmatpush3.bf16.msra.mxu0 %v768_v2  ;;  %679 = vmatpush3.bf16.msra.mxu1 %v776_v6  ;;  %v625_v31 = vld [vmem:[%s1167_s4] ss:$0 sm:$0xff]  ;;  %p872_p6 = scmp.lt.s32.totalorder %s1122_s30, %s870_s14  ;;  %p873_p12 = scmp.lt.s32.totalorder %s871_s16, %s865_s22 }
  0x5d   : > { %660 = vmatprep.subr.bf16.mxu0 %v940_v0  ;;  %680 = vmatprep.subr.bf16.mxu1 %v940_v0  ;;  %p868_p2 = pneg %p867_p1 }
  0x5e   : > { %p874_p7 = por %p873_p12, %p872_p6 }
  0x60   : > { %661 = vmatpush3.bf16.msra.mxu0 %v769_v3  ;;  %681 = vmatpush3.bf16.msra.mxu1 %v777_v13  ;;  %p875_p9 = pnand %p874_p7, %p868_p2 }
  0x61   : > { %662 = vmatprep.subr.bf16.mxu0 %v940_v0  ;;  %682 = vmatprep.subr.bf16.mxu1 %v940_v0 }
  0x64   : > { %663 = vmatpush3.bf16.msra.mxu0 %v770_v5  ;;  %683 = vmatpush3.bf16.msra.mxu1 %v778_v14 }
  0x65   : > { %664 = vmatprep.subr.bf16.mxu0 %v940_v0  ;;  %684 = vmatprep.subr.bf16.mxu1 %v940_v0 }
  0x68   : > { %665 = vmatpush3.bf16.msra.mxu0 %v771_v7  ;;  %685 = vmatpush3.bf16.msra.mxu1 %v779_v15 }
  0x69   : > { %666 = vmatprep.subr.bf16.mxu0 %v940_v0  ;;  %686 = vmatprep.subr.bf16.mxu1 %v940_v0 }
  0x6c   : > { %667 = vmatpush3.bf16.msra.mxu0 %v772_v8  ;;  %687 = vmatpush3.bf16.msra.mxu1 %v780_v16 }
  0x6d   : > { %668 = vmatprep.subr.bf16.mxu0 %v940_v0  ;;  %688 = vmatprep.subr.bf16.mxu1 %v940_v0 }
  0x70   : > { %669 = vmatpush3.bf16.msra.mxu0 %v773_v9  ;;  %689 = vmatpush3.bf16.msra.mxu1 %v781_v17 }
  0x71   : > { %670 = vmatprep.subr.bf16.mxu0 %v940_v0  ;;  %690 = vmatprep.subr.bf16.mxu1 %v940_v0 }
  0x74   : > { %671 = vmatpush3.bf16.msra.mxu0 %v774_v10  ;;  %691 = vmatpush3.bf16.msra.mxu1 %v782_v18 }
  0x77   : > { %673 = vmatmul.mubr.bf16.vlgmr.msra.gmra.mxu0 %v271_v12 }
 0x137   : > { %v377_v20 = vpop.f32.mrf.mxu0 }
 0x138   : > { %v378_v21 = vadd.f32 %v616_v19, %v377_v20 }
 0x139   : > { %v674_v22 = vpop.f32.mrf.mxu0 }
 0x13a   : > { %v384_v23 = vmul.f32 0.70710677, %v378_v21  ;;  %v383_v27 = vmul.f32 0.5, %v378_v21 }
 0x13b   : > { %v380_v24 = vpop.f32.mrf.mxu0 }
 0x13c   : > { %783 = verf.f32 %v384_v23 }
 0x13d   : > { %v675_v25 = vpop.f32.mrf.mxu0 }
 0x149   : > { %v784_v26 = vpop.eup %783 }
 0x14a   : > { %v386_v28 = vadd.f32 1.0, %v784_v26 }
 0x14c   : > { %v387_v29 = vmul.f32 %v386_v28, %v383_v27 }
 0x14e   : > { %v388_v30 = vpack.c.bf16 %v387_v29, %v387_v29 }
 0x150   : > { %693 = vmatmul.mubr.bf16.vlgmr.msra.gmra.mxu1 %v388_v30 }
 0x210   : > { %v494_v32 = vpop.f32.mrf.mxu1 }
 0x211   : > { %v495_v33 = vadd.f32 %v625_v31, %v494_v32 }
 0x212   : > { %v694_v34 = vpop.f32.mrf.mxu1 }
 0x213   : > { %500 = vst [vmem:[%s268_s12] sm:$0xff] %v495_v33 }
 0x214   : > { %v497_v35 = vpop.f32.mrf.mxu1 }
 0x215   : > { %878 = shalt.err (!%p875_p9)
}
 0x216   : > { %s879_s17 = scalar_lea.hbm %s1120_s28, 128  ;;  %s883_s26 = scalar_lea.hbm %s1168_s5, 256 }
 0x217   : > { %p880_p13 = scmp.ne.s32.totalorder %s1120_s28, %s879_s17  ;;  %p884_p4 = scmp.lt.s32.totalorder %s1120_s28, %s1168_s5 }
 0x218   : > { %p885_p8 = scmp.lt.s32.totalorder %s883_s26, %s879_s17 }
 0x219   : > { %p881_p5 = pnand %p880_p13, %p1184_p0 }
 0x21a   : > { %p886_p3 = por %p885_p8, %p884_p4 }
 0x21b   : > { %p882_p10 = pneg %p881_p5 }
 0x21d   : > { %p887_p11 = pnand %p886_p3, %p882_p10 }
 0x21f   : > { %890 = shalt.err (!%p887_p11)
}
 0x220   : > { %706 = dma.vmem_to_hbm [thread:$0]  (%p1184_p0), %s1122_s30, 128, %s1120_s28, %s502_s7   ;;  %v695_v36 = vpop.f32.mrf.mxu1 }
 0x221 PF: > { %s527_s11 = sand.u32 1, %s921_s18   ;;  %p1185_p1 = scmp.ne.s32.totalorder %s1174_s25, 0 }
 0x222   : > { %p1186_p2 = scmp.ge.s32.totalorder %s933_s21, 2  ;;  %s528_s12 = scalar_lea.sflag [#allocation4], %s527_s11 }
 0x224   : > { %p720_p6 = pnand %p1186_p2, %p1185_p1 }
 0x226   : > { %p721_p12 = pneg %p720_p6 }
 0x228   : > { %916 = dma.done.wait (%p721_p12), %s528_s12, 128  }
 0x229   : > { %918 = vsyncadd (%p721_p12), %s528_s12, 4294967168  ;;  %p19_p7 = scmp.ge.s32.totalorder %s1045_s15, 4   ;;  %s1187_s18 = smov %s925_s19 }
 0x22a   : > { %s1188_s19 = smov %s929_s20  ;;  %s1189_s20 = smov %s1061_s27 }
 0x22b   : > { %s1190_s21 = smov %s1045_s15  ;;  %21 = sbr.rel (!%p19_p7) target bundleno = 6 (0x6), region = 93 }
 0x230   :  { %533 = vsyncpa [#allocation3], 1 }
 0x231   :  { %535 = vsyncpa [#allocation3 + $0x1], 1 }
 0x232   :  { %536 = vsyncpa [#allocation6], 1 }
 0x233   :  { %537 = vsyncpa [#allocation4], 1 }
 0x234   :  { %539 = vsyncpa [#allocation4 + $0x1], 1 }

// kernel: tpu_custom_call.1
= control target key start
LH: loop header
LB: loop body
LE: loop exit
PB: predicated region body
PF: predicated region fallthrough
CT: control target
= control target key end

     0   :  { %10 = vsyncpa [#allocation3], 0  ;;  %s1163_s0 = inlined_call_operand.hbm [shape: f32[16,128], index: 0, kind: input, shape index: {}]   ;;  %s1164_s1 = inlined_call_operand.hbm [shape: bf16[128,128], index: 1, kind: input, shape index: {}]   ;;  %s1165_s2 = inlined_call_operand.vmem [shape: f32[1,128], index: 2, kind: input, shape index: {}]   ;;  %s1166_s3 = inlined_call_operand.hbm [shape: bf16[128,128], index: 3, kind: input, shape index: {}]   ;;  %s1167_s4 = inlined_call_operand.vmem [shape: f32[1,128], index: 4, kind: input, shape index: {}]   ;;  %s1168_s5 = inlined_call_operand.hbm [shape: f32[16,128], index: 5, kind: output, shape index: {}]  }
   0x1   :  { %12 = vsyncpa [#allocation3 + $0x1], 0 }
   0x2   :  { %13 = vsyncpa [#allocation6], 0 }
   0x3   :  { %14 = vsyncpa [#allocation4], 0 }
   0x4   :  { %16 = vsyncpa [#allocation4 + $0x1], 0  ;;  %s973_s18 = smov 0   ;;  %s975_s19 = smov 0  }
   0x5   :  { %s977_s20 = smov 0   ;;  %s979_s21 = smov 0  }
   0x6 LB: > { %s994_s22 = sadd.s32 4294967295, %s933_s21   ;;  %s604_s23 = sadd.s32 4294967294, %s933_s21   ;;  %s933_s21 = sphi %s979_s21, %s1190_s21   ;;  %s929_s20 = sphi %s977_s20, %s1189_s20   ;;  %s925_s19 = sphi %s975_s19, %s1188_s19   ;;  %s921_s18 = sphi %s973_s18, %s1187_s18  }
   0x7   : > { %p42_p0 = scmp.ne.s32.totalorder %s925_s19, %s921_s18  ;;  %p1169_p1 = scmp.eq.s32.totalorder %s994_s22, 0 }
   0x8   : > { %p156_p3 = scmp.eq.s32.totalorder %s604_s23, 1  ;;  %p605_p5 = scmp.ge.s32.totalorder %s933_s21, 1 }
   0x9   : > { %p1003_p4 = por %p1169_p1, %p42_p0  ;;  %p163_p7 = scmp.lt.s32.totalorder %s933_s21, 3 }
   0xa   : > { %p1008_p6 = por %p156_p3, %p42_p0  ;;  %s935_s27 = smov [#allocation5]  }
   0xb   : > { %s1173_s24 = scalar_select %p1003_p4, 1, 0 }
   0xc   : > { %s1174_s25 = scalar_select %p1008_p6, 1, 0 }
   0xd   : > { %p1013_p8 = pnand %p605_p5, %p163_p7  ;;  %s175_s28 = sshll.u32 %s935_s27, 4  ;;  %s176_s28 = int_to_ptr.vmem [resolvable:$true] %s175_s28 }
   0xe   : > { %s936_s30 = smov [#allocation7]   ;;  %s796_s7 = scalar_lea.vmem %s176_s28, 1024 }
   0xf   : > { %s1175_s26 = scalar_select %p1013_p8, 1, 0 }
  0x10   : > { %p708_p9 = pneg %p1013_p8  ;;  %s191_s6 = sshll.u32 %s936_s30, 4  ;;  %s192_s6 = int_to_ptr.vmem [resolvable:$true] %s191_s6 }
  0x11   : > { %p797_p13 = scmp.ne.s32.totalorder %s176_s28, %s796_s7  ;;  %p804_p5 = scmp.lt.s32.totalorder %s176_s28, %s176_s28 }
  0x12   : > { %p1022_p11 = pnand %p708_p9, %p1169_p1  ;;  %p805_p7 = scmp.lt.s32.totalorder %s796_s7, %s796_s7 }
  0x14   : > { %p787_p12 = pneg %p1022_p11  ;;  %p806_p10 = por %p805_p7, %p804_p5 }
  0x16   : > { %p799_p0 = pnand %p797_p13, %p787_p12 }
  0x18   : > { %p800_p3 = pneg %p799_p0 }
  0x1a   : > { %p807_p9 = pnand %p806_p10, %p800_p3 }
  0x1c   : > { %810 = shalt.err (!%p807_p9)
}
  0x1d   : > { %s937_s8 = smov 64   ;;  %s938_s9 = smov 4  }
  0x1e   : > { %711 = dma.hbm_to_vmem [thread:$0]  (!%p1022_p11), %s1164_s1, 1024, %s176_s28, [#allocation6], %s937_s8, %s937_s8, %s938_s9  }
  0x1f   : > { %s822_s12 = scalar_lea.vmem %s192_s6, 1024  ;;  %p830_p2 = scmp.lt.s32.totalorder %s192_s6, %s192_s6 }
  0x20   : > { %p823_p1 = scmp.ne.s32.totalorder %s192_s6, %s822_s12  ;;  %p831_p6 = scmp.lt.s32.totalorder %s822_s12, %s822_s12 }
  0x22   : > { %p825_p13 = pnand %p823_p1, %p787_p12  ;;  %p832_p5 = por %p831_p6, %p830_p2 }
  0x24   : > { %p826_p0 = pneg %p825_p13 }
  0x26   : > { %p833_p10 = pnand %p832_p5, %p826_p0 }
  0x28   : > { %836 = shalt.err (!%p833_p10)
}
  0x29   : > { %714 = dma.hbm_to_vmem [thread:$0]  (!%p1022_p11), %s1166_s3, 1024, %s192_s6, [#allocation6], %s937_s8, %s937_s8, %s938_s9  }
  0x2a   : > { %s1045_s15 = sadd.s32 1, %s933_s21   ;;  %s29_s16 = sadd.s32 1, %s929_s20 }
  0x2b   : > { %s26_s17 = ssub.s32 %s933_s21, %s1045_s15  ;;  %p36_p1 = scmp.ne.s32.totalorder %s929_s20, %s925_s19 }
  0x2c   : > { %p27_p2 = scmp.eq.s32.totalorder %s26_s17, 0  ;;  %p37_p6 = scmp.eq.s32.totalorder %s933_s21, 0 }
  0x2d   : > { %p1177_p12 = scmp.eq.s32.totalorder %s994_s22, 1  ;;  %p725_p7 = scmp.lt.s32.totalorder %s933_s21, 2 }
  0x2e   : > { %s1061_s27 = scalar_select %p27_p2, %s929_s20, %s29_s16  }
  0x2f   : > { %p1055_p3 = por %p1177_p12, %p36_p1  ;;  %p38_p9 = por %p37_p6, %p36_p1 }
  0x30   : > { %s208_s28 = sand.u32 1, %s929_s20   ;;  %s610_s30 = sshll.u32 %s933_s21, 7 }
  0x31   : > { %s1178_s23 = scalar_select %p1055_p3, 1, 0 }
  0x32   : > { %s609_s29 = sshll.u32 %s208_s28, 3  ;;  %s1068_s8 = scalar_lea.hbm %s1163_s0, %s610_s30 }
  0x33   : > { %s212_s9 = scalar_lea.vmem [#allocation2], %s609_s29  ;;  %p1070_p11 = pnand %p725_p7, %p38_p9 }
  0x34   : > { %s219_s10 = sshll.u32 %s212_s9, 4  ;;  %s209_s12 = scalar_lea.sflag [#allocation3], %s208_s28  ;;  %s220_s10 = int_to_ptr.vmem [resolvable:$true] %s219_s10 }
  0x35   : > { %s837_s13 = scalar_lea.hbm %s1068_s8, 128  ;;  %p839_p0 = pneg %p1070_p11 }
  0x36   : > { %p838_p13 = scmp.ne.s32.totalorder %s1068_s8, %s837_s13  ;;  %s842_s17 = scalar_lea.hbm %s1163_s0, 256 }
  0x37   : > { %p843_p1 = scmp.lt.s32.totalorder %s1068_s8, %s1163_s0  ;;  %p844_p2 = scmp.lt.s32.totalorder %s842_s17, %s837_s13 }
  0x38   : > { %p840_p5 = pnand %p839_p0, %p838_p13 }
  0x39   : > { %p845_p6 = por %p844_p2, %p843_p1 }
  0x3a   : > { %p841_p10 = pneg %p840_p5 }
  0x3c   : > { %p846_p12 = pnand %p845_p6, %p841_p10 }
  0x3e   : > { %849 = shalt.err (!%p846_p12)
}
  0x3f   : > { %s850_s6 = scalar_lea.vmem %s220_s10, 128  ;;  %s939_s28 = smov [#allocation2]  }
  0x40   : > { %p851_p7 = scmp.ne.s32.totalorder %s220_s10, %s850_s6  ;;  %s855_s7 = sshll.u32 %s939_s28, 4  ;;  %s856_s7 = int_to_ptr.vmem [resolvable:$false] %s855_s7 }
  0x41   : > { %s857_s9 = scalar_lea.vmem %s856_s7, 256  ;;  %p858_p13 = scmp.lt.s32.totalorder %s220_s10, %s856_s7 }
  0x42   : > { %p853_p9 = pnand %p851_p7, %p839_p0  ;;  %p859_p5 = scmp.lt.s32.totalorder %s857_s9, %s850_s6 }
  0x44   : > { %p854_p3 = pneg %p853_p9  ;;  %p860_p4 = por %p859_p5, %p858_p13 }
  0x46   : > { %p861_p8 = pnand %p860_p4, %p854_p3 }
  0x48   : > { %864 = shalt.err (!%p861_p8)
}
  0x49   : > { %718 = dma.hbm_to_vmem [thread:$0]  (!%p1070_p11), %s1068_s8, 128, %s220_s10, %s209_s12  }
  0x4a   : > { %p1180_p10 = scmp.ne.s32.totalorder %s1175_s26, 0 }
  0x4b   : > { %s1091_s13 = sand.u32 (!%p1180_p10), 1, %s925_s19   ;;  %p1181_p4 = scmp.ne.s32.totalorder (!%p1180_p10), %s1173_s24, 0 }
  0x4c   : > { %228 = sbr.rel (%p1180_p10) target bundleno = 545 (0x221), region = 40  ;;  %s612_s14 = sshll.u32 (!%p1180_p10), %s1091_s13, 3 }
  0x4d   : > { %s231_s16 = scalar_lea.sflag (!%p1180_p10), [#allocation3], %s1091_s13  ;;  %s1097_s17 = scalar_lea.vmem (!%p1180_p10), [#allocation2], %s612_s14 }
  0x51   : > { %908 = dma.done.wait (%p1181_p4), %s231_s16, 128  }
  0x52   : > { %910 = vsyncadd (%p1181_p4), %s231_s16, 4294967168  ;;  %p1182_p8 = scmp.eq.s32.totalorder %s994_s22, 0 }
  0x54   : > { %912 = dma.done.wait (%p1182_p8), [#allocation6], 2048   ;;  %p1183_p3 = pmov %p1182_p8 }
  0x55   : > { %v940_v0 = vmov 0.0   ;;  %vm941_vm0 = vmmov 0   ;;  %v767_v1 = vld [vmem:[#allocation5 + $0x38] sm:$0xff]   ;;  %v768_v2 = vld [vmem:[#allocation5 + $0x30] sm:$0xff]   ;;  %v769_v3 = vld [vmem:[#allocation5 + $0x28] sm:$0xff]   ;;  %s635_s11 = sshll.u32 %s994_s22, 7 }
  0x56   : > { %914 = vsyncadd (%p1183_p3), [#allocation6], 4294965248  ;;  %656 = vmatprep.subr.bf16.mxu0 %v940_v0  ;;  %672 = vmatprep.mubr.msk.bf16.mxu0 %vm941_vm0, %v940_v0  ;;  %v775_v4 = vld [vmem:[#allocation7 + $0x38] sm:$0xff]   ;;  %v770_v5 = vld [vmem:[#allocation5 + $0x20] sm:$0xff]   ;;  %s268_s12 = scalar_lea.vmem [#allocation8], %s612_s14  ;;  %s1120_s28 = scalar_lea.hbm %s1168_s5, %s635_s11 }
  0x57   : > { %676 = vmatprep.subr.bf16.mxu1 %v940_v0  ;;  %692 = vmatprep.mubr.msk.bf16.mxu1 %vm941_vm0, %v940_v0  ;;  %v776_v6 = vld [vmem:[#allocation7 + $0x30] sm:$0xff]   ;;  %v771_v7 = vld [vmem:[#allocation5 + $0x18] sm:$0xff]   ;;  %v773_v9 = vld [vmem:[#allocation5 + $0x8] sm:$0xff]   ;;  %s515_s30 = sshll.u32 %s268_s12, 4  ;;  %s502_s7 = scalar_lea.sflag [#allocation4], %s1091_s13  ;;  %s1122_s30 = int_to_ptr.vmem [resolvable:$true] %s515_s30 }
  0x58   : > { %657 = vmatpush3.bf16.msra.mxu0 %v767_v1  ;;  %677 = vmatpush3.bf16.msra.mxu1 %v775_v4  ;;  %v772_v8 = vld [vmem:[#allocation5 + $0x10] sm:$0xff]   ;;  %v774_v10 = vld [vmem:[#allocation5] sm:$0xff]   ;;  %v777_v13 = vld [vmem:[#allocation7 + $0x28] sm:$0xff]   ;;  %s865_s22 = scalar_lea.vmem %s1122_s30, 128  ;;  %p1184_p0 = scmp.ne.s32.totalorder %s1178_s23, 0 }
  0x59   : > { %658 = vmatprep.subr.bf16.mxu0 %v940_v0  ;;  %678 = vmatprep.subr.bf16.mxu1 %v940_v0  ;;  %v270_v11 = vld [vmem:[%s1097_s17] sm:$0xff]  ;;  %v778_v14 = vld [vmem:[#allocation7 + $0x20] sm:$0xff]   ;;  %v781_v17 = vld [vmem:[#allocation7 + $0x8] sm:$0xff]   ;;  %p866_p11 = scmp.ne.s32.totalorder %s1122_s30, %s865_s22  ;;  %s942_s9 = smov [#allocation8]  }
  0x5a   : > { %v271_v12 = vpack.c.bf16 %v270_v11, %v270_v11  ;;  %v779_v15 = vld [vmem:[#allocation7 + $0x18] sm:$0xff]   ;;  %v780_v16 = vld [vmem:[#allocation7 + $0x10] sm:$0xff]   ;;  %v782_v18 = vld [vmem:[#allocation7] sm:$0xff]   ;;  %s869_s14 = sshll.u32 %s942_s9, 4  ;;  %s870_s14 = int_to_ptr.vmem [resolvable:$false] %s869_s14 }
  0x5b   : > { %v616_v19 = vld [vmem:[%s1165_s2] ss:$0 sm:$0xff]  ;;  %p867_p1 = pnand %p866_p11, %p1184_p0  ;;  %s871_s16 = scalar_lea.vmem %s870_s14, 256 }
  0x5c   : > { %659 = vmatpush3.bf16.msra.mxu0 %v768_v2  ;;  %679 = vmatpush3.bf16.msra.mxu1 %v776_v6  ;;  %v625_v31 = vld [vmem:[%s1167_s4] ss:$0 sm:$0xff]  ;;  %p872_p6 = scmp.lt.s32.totalorder %s1122_s30, %s870_s14  ;;  %p873_p12 = scmp.lt.s32.totalorder %s871_s16, %s865_s22 }
  0x5d   : > { %660 = vmatprep.subr.bf16.mxu0 %v940_v0  ;;  %680 = vmatprep.subr.bf16.mxu1 %v940_v0  ;;  %p868_p2 = pneg %p867_p1 }
  0x5e   : > { %p874_p7 = por %p873_p12, %p872_p6 }
  0x60   : > { %661 = vmatpush3.bf16.msra.mxu0 %v769_v3  ;;  %681 = vmatpush3.bf16.msra.mxu1 %v777_v13  ;;  %p875_p9 = pnand %p874_p7, %p868_p2 }
  0x61   : > { %662 = vmatprep.subr.bf16.mxu0 %v940_v0  ;;  %682 = vmatprep.subr.bf16.mxu1 %v940_v0 }
  0x64   : > { %663 = vmatpush3.bf16.msra.mxu0 %v770_v5  ;;  %683 = vmatpush3.bf16.msra.mxu1 %v778_v14 }
  0x65   : > { %664 = vmatprep.subr.bf16.mxu0 %v940_v0  ;;  %684 = vmatprep.subr.bf16.mxu1 %v940_v0 }
  0x68   : > { %665 = vmatpush3.bf16.msra.mxu0 %v771_v7  ;;  %685 = vmatpush3.bf16.msra.mxu1 %v779_v15 }
  0x69   : > { %666 = vmatprep.subr.bf16.mxu0 %v940_v0  ;;  %686 = vmatprep.subr.bf16.mxu1 %v940_v0 }
  0x6c   : > { %667 = vmatpush3.bf16.msra.mxu0 %v772_v8  ;;  %687 = vmatpush3.bf16.msra.mxu1 %v780_v16 }
  0x6d   : > { %668 = vmatprep.subr.bf16.mxu0 %v940_v0  ;;  %688 = vmatprep.subr.bf16.mxu1 %v940_v0 }
  0x70   : > { %669 = vmatpush3.bf16.msra.mxu0 %v773_v9  ;;  %689 = vmatpush3.bf16.msra.mxu1 %v781_v17 }
  0x71   : > { %670 = vmatprep.subr.bf16.mxu0 %v940_v0  ;;  %690 = vmatprep.subr.bf16.mxu1 %v940_v0 }
  0x74   : > { %671 = vmatpush3.bf16.msra.mxu0 %v774_v10  ;;  %691 = vmatpush3.bf16.msra.mxu1 %v782_v18 }
  0x77   : > { %673 = vmatmul.mubr.bf16.vlgmr.msra.gmra.mxu0 %v271_v12 }
 0x137   : > { %v377_v20 = vpop.f32.mrf.mxu0 }
 0x138   : > { %v378_v21 = vadd.f32 %v616_v19, %v377_v20 }
 0x139   : > { %v674_v22 = vpop.f32.mrf.mxu0 }
 0x13a   : > { %v384_v23 = vmul.f32 0.70710677, %v378_v21  ;;  %v383_v27 = vmul.f32 0.5, %v378_v21 }
 0x13b   : > { %v380_v24 = vpop.f32.mrf.mxu0 }
 0x13c   : > { %783 = verf.f32 %v384_v23 }
 0x13d   : > { %v675_v25 = vpop.f32.mrf.mxu0 }
 0x149   : > { %v784_v26 = vpop.eup %783 }
 0x14a   : > { %v386_v28 = vadd.f32 1.0, %v784_v26 }
 0x14c   : > { %v387_v29 = vmul.f32 %v386_v28, %v383_v27 }
 0x14e   : > { %v388_v30 = vpack.c.bf16 %v387_v29, %v387_v29 }
 0x150   : > { %693 = vmatmul.mubr.bf16.vlgmr.msra.gmra.mxu1 %v388_v30 }
 0x210   : > { %v494_v32 = vpop.f32.mrf.mxu1 }
 0x211   : > { %v495_v33 = vadd.f32 %v625_v31, %v494_v32 }
 0x212   : > { %v694_v34 = vpop.f32.mrf.mxu1 }
 0x213   : > { %500 = vst [vmem:[%s268_s12] sm:$0xff] %v495_v33 }
 0x214   : > { %v497_v35 = vpop.f32.mrf.mxu1 }
 0x215   : > { %878 = shalt.err (!%p875_p9)
}
 0x216   : > { %s879_s17 = scalar_lea.hbm %s1120_s28, 128  ;;  %s883_s26 = scalar_lea.hbm %s1168_s5, 256 }
 0x217   : > { %p880_p13 = scmp.ne.s32.totalorder %s1120_s28, %s879_s17  ;;  %p884_p4 = scmp.lt.s32.totalorder %s1120_s28, %s1168_s5 }
 0x218   : > { %p885_p8 = scmp.lt.s32.totalorder %s883_s26, %s879_s17 }
 0x219   : > { %p881_p5 = pnand %p880_p13, %p1184_p0 }
 0x21a   : > { %p886_p3 = por %p885_p8, %p884_p4 }
 0x21b   : > { %p882_p10 = pneg %p881_p5 }
 0x21d   : > { %p887_p11 = pnand %p886_p3, %p882_p10 }
 0x21f   : > { %890 = shalt.err (!%p887_p11)
}
 0x220   : > { %706 = dma.vmem_to_hbm [thread:$0]  (%p1184_p0), %s1122_s30, 128, %s1120_s28, %s502_s7   ;;  %v695_v36 = vpop.f32.mrf.mxu1 }
 0x221 PF: > { %s527_s11 = sand.u32 1, %s921_s18   ;;  %p1185_p1 = scmp.ne.s32.totalorder %s1174_s25, 0 }
 0x222   : > { %p1186_p2 = scmp.ge.s32.totalorder %s933_s21, 2  ;;  %s528_s12 = scalar_lea.sflag [#allocation4], %s527_s11 }
 0x224   : > { %p720_p6 = pnand %p1186_p2, %p1185_p1 }
 0x226   : > { %p721_p12 = pneg %p720_p6 }
 0x228   : > { %916 = dma.done.wait (%p721_p12), %s528_s12, 128  }
 0x229   : > { %918 = vsyncadd (%p721_p12), %s528_s12, 4294967168  ;;  %p19_p7 = scmp.ge.s32.totalorder %s1045_s15, 4   ;;  %s1187_s18 = smov %s925_s19 }
 0x22a   : > { %s1188_s19 = smov %s929_s20  ;;  %s1189_s20 = smov %s1061_s27 }
 0x22b   : > { %s1190_s21 = smov %s1045_s15  ;;  %21 = sbr.rel (!%p19_p7) target bundleno = 6 (0x6), region = 93 }
 0x230   :  { %533 = vsyncpa [#allocation3], 1 }
 0x231   :  { %535 = vsyncpa [#allocation3 + $0x1], 1 }
 0x232   :  { %536 = vsyncpa [#allocation6], 1 }
 0x233   :  { %537 = vsyncpa [#allocation4], 1 }
 0x234   :  { %539 = vsyncpa [#allocation4 + $0x1], 1 }

</bundles_post_ra>
